<compile_context>
chip_gen: v7x
topology: tpu7x:2x2x1
jax: 0.10.0
libtpu: 0.0.40
codegen_flags: <defaults>
</compile_context>

<pallas_src>
import functools

import jax
import jax.numpy as jnp
from jax import lax
from jax.experimental import pallas as pl
from jax.experimental.pallas import tpu as pltpu


def _round_up(n, m):
    return ((n + m - 1) // m) * m


def _lstm_layer_kernel(x_ref, wih_ref, whh_ref, b_ref, h0_ref, c0_ref,
                       y_ref, cn_ref, h_sc, c_sc, gx_sc,
                       *, hidden_dim, t_chunk, b_pad, seq_len):
    H = hidden_dim
    chunk = pl.program_id(0)
    mm_dtype = wih_ref.dtype                 # bf16 (or f32) MXU input dtype

    @pl.when(chunk == 0)
    def _init():
        h_sc[...] = h0_ref[...]
        c_sc[...] = c0_ref[...]

    # Valid timesteps in this chunk (last chunk may be partial).
    steps = jnp.minimum(t_chunk, seq_len - chunk * t_chunk)

    # Deterministic zeros for padded-tail rows of y (only on a partial chunk).
    @pl.when(steps < t_chunk)
    def _zero_tail():
        y_ref[...] = jnp.zeros_like(y_ref)

    # Hoisted input projection for the whole chunk: one large, MXU-efficient
    # matmul over T_CHUNK * B_pad rows (instead of a 2-row matmul per step).
    gx_sc[...] = (
        jnp.dot(x_ref[...].astype(mm_dtype), wih_ref[...],
                preferred_element_type=jnp.float32)
        + b_ref[...])

    def _sigmoid(v):
        # sigmoid(x) = 0.5 * tanh(0.5 x) + 0.5 : one EUP op, mul/add ride VALU.
        return 0.5 * jnp.tanh(0.5 * v) + 0.5

    def step(t, carry):
        h, c = carry                                          # f32 (B_pad, H)
        row = pl.multiple_of(t * b_pad, b_pad)                # sublane-aligned
        gates = gx_sc[pl.ds(row, b_pad), :] + jnp.dot(        # (B_pad, 4H) f32
            h.astype(mm_dtype), whh_ref[...],
            preferred_element_type=jnp.float32)
        i_g = _sigmoid(gates[:, 0 * H:1 * H])
        f_g = _sigmoid(gates[:, 1 * H:2 * H])
        g_g = jnp.tanh(gates[:, 2 * H:3 * H])
        o_g = _sigmoid(gates[:, 3 * H:4 * H])
        c_new = f_g * c + i_g * g_g
        h_new = o_g * jnp.tanh(c_new)
        y_ref[pl.ds(row, b_pad), :] = h_new                   # per-step hidden
        return h_new, c_new

    h_out, c_out = lax.fori_loop(0, steps, step, (h_sc[...], c_sc[...]))
    h_sc[...] = h_out
    c_sc[...] = c_out

    @pl.when(chunk == pl.num_programs(0) - 1)
    def _final():
        cn_ref[...] = c_out


def _lstm_layer_call(x2d, wih_t, whh_t, bias, h0, c0,
                     *, seq_len, b_pad, t_chunk, hidden_dim):
    """One LSTM layer over the whole (time-chunked) sequence.

    x2d:  (S_pad*B_pad, D) f32 — time-major, (t, b) flattened into rows
    wih_t:(D, 4H), whh_t:(H, 4H) — pre-transposed, possibly bf16
    bias: (1, 4H) f32 (b_ih + b_hh);  h0, c0: (B_pad, H) f32
    Returns (y2d (S_pad*B_pad, H) f32, cn (B_pad, H) f32).
    """
    rows, D = x2d.shape
    H = hidden_dim
    chunk_rows = t_chunk * b_pad
    num_chunks = rows // chunk_rows

    kernel = functools.partial(_lstm_layer_kernel, hidden_dim=H,
                               t_chunk=t_chunk, b_pad=b_pad, seq_len=seq_len)

    return pl.pallas_call(
        kernel,
        out_shape=(
            jax.ShapeDtypeStruct((rows, H), jnp.float32),      # y (all steps)
            jax.ShapeDtypeStruct((b_pad, H), jnp.float32),     # final c
        ),
        grid_spec=pltpu.PrefetchScalarGridSpec(
            num_scalar_prefetch=0,
            grid=(num_chunks,),
            in_specs=[
                pl.BlockSpec((chunk_rows, D), lambda c: (c, 0)),    # x chunk
                pl.BlockSpec((D, 4 * H), lambda c: (0, 0)),         # W_ih^T
                pl.BlockSpec((H, 4 * H), lambda c: (0, 0)),         # W_hh^T
                pl.BlockSpec((1, 4 * H), lambda c: (0, 0)),         # bias
                pl.BlockSpec((b_pad, H), lambda c: (0, 0)),         # h0
                pl.BlockSpec((b_pad, H), lambda c: (0, 0)),         # c0
            ],
            out_specs=[
                pl.BlockSpec((chunk_rows, H), lambda c: (c, 0)),    # y chunk
                pl.BlockSpec((b_pad, H), lambda c: (0, 0)),         # cn
            ],
            scratch_shapes=[
                pltpu.VMEM((b_pad, H), jnp.float32),                # h state
                pltpu.VMEM((b_pad, H), jnp.float32),                # c state
                pltpu.VMEM((chunk_rows, 4 * H), jnp.float32),       # x-proj gx
            ],
        ),
        compiler_params=pltpu.CompilerParams(
            dimension_semantics=("arbitrary",)),    # time chunks are sequential
    )(x2d, wih_t, whh_t, bias, h0, c0)


def preprocess_params(params, weight_dtype=jnp.bfloat16):
    """One-time parameter prep (hoisted out of the forward pass):
    transpose to (in, 4H), pre-sum biases, optionally cast weights to bf16."""
    prepped = []
    for (w_ih, w_hh, b_ih, b_hh) in params:
        four_h = w_ih.shape[0]
        prepped.append((
            jnp.transpose(w_ih).astype(weight_dtype),             # (D, 4H)
            jnp.transpose(w_hh).astype(weight_dtype),             # (H, 4H)
            (b_ih + b_hh).reshape(1, four_h).astype(jnp.float32),  # (1, 4H)
        ))
    return prepped


def inference_lstm_forward(prepped_params, x, hn_0, cn_0, *, t_chunk=64):
    """Equivalent of inferencelLSTM.forward: returns (hn, cn), each of shape
    (num_layer, batch, hidden_dim).  x is time-major (S, B, D)."""
    S, B, D = x.shape
    num_layer = len(prepped_params)
    H = hn_0.shape[-1]

    B_pad = _round_up(B, 8)                    # f32 sublane count
    T = max(1, min(t_chunk, S))
    num_chunks = (S + T - 1) // T
    S_pad = num_chunks * T

    # Pad once (time -> S_pad, batch -> B_pad) and flatten (t, b) into rows.
    xp = jnp.zeros((S_pad, B_pad, D), jnp.float32).at[:S, :B].set(
        x.astype(jnp.float32))
    x2d = xp.reshape(S_pad * B_pad, D)
    h0p = jnp.zeros((num_layer, B_pad, H), jnp.float32).at[:, :B].set(
        hn_0.astype(jnp.float32))
    c0p = jnp.zeros((num_layer, B_pad, H), jnp.float32).at[:, :B].set(
        cn_0.astype(jnp.float32))

    hn_list, cn_list = [], []
    layer_in = x2d
    for l in range(num_layer):
        wih_t, whh_t, bias = prepped_params[l]
        y2d, cn_l = _lstm_layer_call(
            layer_in, wih_t, whh_t, bias, h0p[l], c0p[l],
            seq_len=S, b_pad=B_pad, t_chunk=T, hidden_dim=H)
        hn_list.append(y2d.reshape(S_pad, B_pad, H)[S - 1, :B])  # hn == y[S-1]
        cn_list.append(cn_l[:B])
        layer_in = y2d          # feed padded layout straight to the next layer
    return jnp.stack(hn_list, axis=0), jnp.stack(cn_list, axis=0)


def _lstm_reference(prepped_params, x, h0, c0):
    """Pure-JAX (f32) reference implementing nn.LSTM forward semantics."""
    layer_in = x
    hns, cns = [], []
    for l, (wih_t, whh_t, bias) in enumerate(prepped_params):
        wih = wih_t.astype(jnp.float32)
        whh = whh_t.astype(jnp.float32)
        b = bias.astype(jnp.float32)
        H = whh.shape[0]

        def step(carry, x_t, wih=wih, whh=whh, b=b, H=H):
            h, c = carry
            gates = x_t @ wih + h @ whh + b
            i = jax.nn.sigmoid(gates[:, 0 * H:1 * H])
            f = jax.nn.sigmoid(gates[:, 1 * H:2 * H])
            g = jnp.tanh(gates[:, 2 * H:3 * H])
            o = jax.nn.sigmoid(gates[:, 3 * H:4 * H])
            c_new = f * c + i * g
            h_new = o * jnp.tanh(c_new)
            return (h_new, c_new), h_new

        (h_f, c_f), ys = lax.scan(step, (h0[l], c0[l]), layer_in)
        hns.append(h_f)
        cns.append(c_f)
        layer_in = ys
    return jnp.stack(hns, 0), jnp.stack(cns, 0)


def init_lstm_params(key, input_dim, hidden_dim, num_layer):
    """nn.LSTM-style init: U(-1/sqrt(H), 1/sqrt(H))."""
    k = 1.0 / jnp.sqrt(jnp.float32(hidden_dim))
    params = []
    for l in range(num_layer):
        in_dim = input_dim if l == 0 else hidden_dim
        key, k1, k2, k3, k4 = jax.random.split(key, 5)
        w_ih = jax.random.uniform(k1, (4 * hidden_dim, in_dim), jnp.float32, -k, k)
        w_hh = jax.random.uniform(k2, (4 * hidden_dim, hidden_dim), jnp.float32, -k, k)
        b_ih = jax.random.uniform(k3, (4 * hidden_dim,), jnp.float32, -k, k)
        b_hh = jax.random.uniform(k4, (4 * hidden_dim,), jnp.float32, -k, k)
        params.append((w_ih, w_hh, b_ih, b_hh))
    return params


if __name__ == "__main__":
    # Small shapes consistent with the module's forward (seq-major nn.LSTM).
    seq_len, batch, input_dim, hidden_dim, num_layer = 8, 2, 16, 32, 2

    key = jax.random.PRNGKey(0)
    key, kx, kh, kc = jax.random.split(key, 4)
    x = jax.random.normal(kx, (seq_len, batch, input_dim), jnp.float32)
    hn_0 = jax.random.normal(kh, (num_layer, batch, hidden_dim), jnp.float32)
    cn_0 = jax.random.normal(kc, (num_layer, batch, hidden_dim), jnp.float32)
    params = init_lstm_params(key, input_dim, hidden_dim, num_layer)

    fwd = jax.jit(inference_lstm_forward)

    # --- f32-weight path: tight check of kernel plumbing vs pure-JAX reference.
    pp_f32 = preprocess_params(params, weight_dtype=jnp.float32)
    hn32, cn32 = jax.block_until_ready(fwd(pp_f32, x, hn_0, cn_0))
    hn_ref, cn_ref = _lstm_reference(pp_f32, x, hn_0, cn_0)
    assert hn32.shape == (num_layer, batch, hidden_dim)
    assert cn32.shape == (num_layer, batch, hidden_dim)
    assert jnp.allclose(hn32, hn_ref, atol=1e-4, rtol=1e-4)
    assert jnp.allclose(cn32, cn_ref, atol=1e-4, rtol=1e-4)

    # --- bf16-weight path (optimized inference): sanity vs the f32 reference.
    pp_bf16 = preprocess_params(params, weight_dtype=jnp.bfloat16)
    hn, cn = jax.block_until_ready(fwd(pp_bf16, x, hn_0, cn_0))
    assert hn.shape == (num_layer, batch, hidden_dim)
    assert cn.shape == (num_layer, batch, hidden_dim)
    assert jnp.allclose(hn, hn_ref, atol=5e-2, rtol=0.0)
    assert jnp.allclose(cn, cn_ref, atol=1e-1, rtol=0.0)

    print("KERNEL_OK")
</pallas_src>

<mosaic_0001>
module attributes {stable_mosaic.version = 11 : i64} {
  func.func @_lstm_layer_kernel(%arg0: i32, %arg1: memref<64x16xf32, #tpu.memory_space<vmem>>, %arg2: memref<16x128xf32, #tpu.memory_space<vmem>>, %arg3: memref<32x128xf32, #tpu.memory_space<vmem>>, %arg4: memref<1x128xf32, #tpu.memory_space<vmem>>, %arg5: memref<8x32xf32, #tpu.memory_space<vmem>>, %arg6: memref<8x32xf32, #tpu.memory_space<vmem>>, %arg7: memref<64x32xf32, #tpu.memory_space<vmem>>, %arg8: memref<8x32xf32, #tpu.memory_space<vmem>>, %arg9: memref<8x32xf32, #tpu.memory_space<vmem>>, %arg10: memref<8x32xf32, #tpu.memory_space<vmem>>, %arg11: memref<64x128xf32, #tpu.memory_space<vmem>>) attributes {dimension_semantics = [#tpu.dimension_semantics<arbitrary>], iteration_bounds = array<i64: 1>, scalar_prefetch = 0 : i64, scratch_operands = 3 : i64, tpu.core_type = #tpu.core_type<tc>, window_params = [{transform_indices = @transform_0, window_bounds = array<i64: 64, 16>}, {pipeline_mode = #tpu.pipeline_mode<synchronous>, transform_indices = @transform_1, window_bounds = array<i64: 16, 128>}, {pipeline_mode = #tpu.pipeline_mode<synchronous>, transform_indices = @transform_2, window_bounds = array<i64: 32, 128>}, {pipeline_mode = #tpu.pipeline_mode<synchronous>, transform_indices = @transform_3, window_bounds = array<i64: 1, 128>}, {pipeline_mode = #tpu.pipeline_mode<synchronous>, transform_indices = @transform_4, window_bounds = array<i64: 8, 32>}, {pipeline_mode = #tpu.pipeline_mode<synchronous>, transform_indices = @transform_5, window_bounds = array<i64: 8, 32>}, {transform_indices = @transform_6, window_bounds = array<i64: 64, 32>}, {pipeline_mode = #tpu.pipeline_mode<synchronous>, transform_indices = @transform_7, window_bounds = array<i64: 8, 32>}]} {
    %c0_i32 = arith.constant 0 : i32
    %0 = arith.cmpi eq, %arg0, %c0_i32 : i32
    %1 = arith.extui %0 : i1 to i32
    %c0_i32_0 = arith.constant 0 : i32
    %2 = arith.cmpi ne, %1, %c0_i32_0 : i32
    scf.if %2 {
      %c0_23 = arith.constant 0 : index
      %c0_24 = arith.constant 0 : index
      %26 = vector.load %arg5[%c0_23, %c0_24] : memref<8x32xf32, #tpu.memory_space<vmem>>, vector<8x32xf32>
      %c0_25 = arith.constant 0 : index
      %c0_26 = arith.constant 0 : index
      %27 = vector.load %arg9[%c0_25, %c0_26] : memref<8x32xf32, #tpu.memory_space<vmem>>, vector<8x32xf32>
      tpu.vector_store %arg9[%c0_25, %c0_26], %26 {strides = array<i32>} : memref<8x32xf32, #tpu.memory_space<vmem>>, vector<8x32xf32>,
      %c0_27 = arith.constant 0 : index
      %c0_28 = arith.constant 0 : index
      %28 = vector.load %arg6[%c0_27, %c0_28] : memref<8x32xf32, #tpu.memory_space<vmem>>, vector<8x32xf32>
      %c0_29 = arith.constant 0 : index
      %c0_30 = arith.constant 0 : index
      %29 = vector.load %arg10[%c0_29, %c0_30] : memref<8x32xf32, #tpu.memory_space<vmem>>, vector<8x32xf32>
      tpu.vector_store %arg10[%c0_29, %c0_30], %28 {strides = array<i32>} : memref<8x32xf32, #tpu.memory_space<vmem>>, vector<8x32xf32>,
    } else {
    }
    %c8_i32 = arith.constant 8 : i32
    %3 = arith.muli %arg0, %c8_i32 : i32
    %c8_i32_1 = arith.constant 8 : i32
    %4 = arith.subi %c8_i32_1, %3 : i32
    %c8_i32_2 = arith.constant 8 : i32
    %5 = arith.minsi %c8_i32_2, %4 : i32
    %c8_i32_3 = arith.constant 8 : i32
    %6 = arith.cmpi slt, %5, %c8_i32_3 : i32
    %7 = arith.extui %6 : i1 to i32
    %c0_i32_4 = arith.constant 0 : i32
    %8 = arith.cmpi ne, %7, %c0_i32_4 : i32
    scf.if %8 {
      %cst_23 = arith.constant 0.000000e+00 : f32
      %26 = vector.broadcast %cst_23 : f32 to vector<64x32xf32>
      %c0_24 = arith.constant 0 : index
      %c0_25 = arith.constant 0 : index
      %27 = vector.load %arg7[%c0_24, %c0_25] : memref<64x32xf32, #tpu.memory_space<vmem>>, vector<64x32xf32>
      tpu.vector_store %arg7[%c0_24, %c0_25], %26 {strides = array<i32>} : memref<64x32xf32, #tpu.memory_space<vmem>>, vector<64x32xf32>,
    } else {
    }
    %c0 = arith.constant 0 : index
    %c0_5 = arith.constant 0 : index
    %9 = vector.load %arg1[%c0, %c0_5] : memref<64x16xf32, #tpu.memory_space<vmem>>, vector<64x16xf32>
    %c0_6 = arith.constant 0 : index
    %c0_7 = arith.constant 0 : index
    %10 = vector.load %arg2[%c0_6, %c0_7] : memref<16x128xf32, #tpu.memory_space<vmem>>, vector<16x128xf32>
    %cst = arith.constant dense<0.000000e+00> : vector<64x128xf32>
    %11 = tpu.matmul %9, %10, %cst {dimension_numbers = #tpu.dot_dimension_numbers<[1], [0], [0], [1], [0, 0, 1, 1], [], []>} : vector<64x16xf32>, vector<16x128xf32>, vector<64x128xf32> -> vector<64x128xf32>
    %c0_8 = arith.constant 0 : index
    %c0_9 = arith.constant 0 : index
    %12 = vector.load %arg4[%c0_8, %c0_9] : memref<1x128xf32, #tpu.memory_space<vmem>>, vector<1x128xf32>
    %13 = vector.broadcast %12 : vector<1x128xf32> to vector<64x128xf32>
    %14 = arith.addf %11, %13 : vector<64x128xf32>
    %c0_10 = arith.constant 0 : index
    %c0_11 = arith.constant 0 : index
    %15 = vector.load %arg11[%c0_10, %c0_11] : memref<64x128xf32, #tpu.memory_space<vmem>>, vector<64x128xf32>
    tpu.vector_store %arg11[%c0_10, %c0_11], %14 {strides = array<i32>} : memref<64x128xf32, #tpu.memory_space<vmem>>, vector<64x128xf32>,
    %c0_12 = arith.constant 0 : index
    %c0_13 = arith.constant 0 : index
    %16 = vector.load %arg9[%c0_12, %c0_13] : memref<8x32xf32, #tpu.memory_space<vmem>>, vector<8x32xf32>
    %c0_14 = arith.constant 0 : index
    %c0_15 = arith.constant 0 : index
    %17 = vector.load %arg10[%c0_14, %c0_15] : memref<8x32xf32, #tpu.memory_space<vmem>>, vector<8x32xf32>
    %c0_i32_16 = arith.constant 0 : i32
    %18 = arith.subi %5, %c0_i32_16 : i32
    %19 = arith.addi %c0_i32_16, %18 : i32
    %c1_i32 = arith.constant 1 : i32
    %20:2 = scf.for %arg12 = %c0_i32_16 to %19 step %c1_i32 iter_args(%arg13 = %16, %arg14 = %17) -> (vector<8x32xf32>, vector<8x32xf32>)  : i32 {
      %c8_i32_23 = arith.constant 8 : i32
      %26 = arith.muli %arg12, %c8_i32_23 : i32
      %27 = tpu.assume_multiple %26, 8 : i32
      %28 = arith.index_cast %27 : i32 to index
      %c0_24 = arith.constant 0 : index
      %29 = vector.load %arg11[%28, %c0_24] : memref<64x128xf32, #tpu.memory_space<vmem>>, vector<8x128xf32>
      %c0_25 = arith.constant 0 : index
      %c0_26 = arith.constant 0 : index
      %30 = vector.load %arg3[%c0_25, %c0_26] : memref<32x128xf32, #tpu.memory_space<vmem>>, vector<32x128xf32>
      %cst_27 = arith.constant dense<0.000000e+00> : vector<8x128xf32>
      %31 = tpu.matmul %arg13, %30, %cst_27 {dimension_numbers = #tpu.dot_dimension_numbers<[1], [0], [0], [1], [0, 0, 1, 1], [], []>} : vector<8x32xf32>, vector<32x128xf32>, vector<8x128xf32> -> vector<8x128xf32>
      %32 = arith.addf %29, %31 : vector<8x128xf32>
      %33 = vector.extract_strided_slice %32 {offsets = [0, 0], sizes = [8, 32], strides = [1, 1]} : vector<8x128xf32> to vector<8x32xf32>
      %cst_28 = arith.constant 5.000000e-01 : f32
      %34 = vector.broadcast %cst_28 : f32 to vector<8x32xf32>
      %35 = arith.mulf %34, %33 : vector<8x32xf32>
      %36 = math.tanh %35 : vector<8x32xf32>
      %cst_29 = arith.constant 5.000000e-01 : f32
      %37 = vector.broadcast %cst_29 : f32 to vector<8x32xf32>
      %38 = arith.mulf %37, %36 : vector<8x32xf32>
      %cst_30 = arith.constant 5.000000e-01 : f32
      %39 = vector.broadcast %cst_30 : f32 to vector<8x32xf32>
      %40 = arith.addf %38, %39 : vector<8x32xf32>
      %41 = vector.extract_strided_slice %32 {offsets = [0, 32], sizes = [8, 32], strides = [1, 1]} : vector<8x128xf32> to vector<8x32xf32>
      %cst_31 = arith.constant 5.000000e-01 : f32
      %42 = vector.broadcast %cst_31 : f32 to vector<8x32xf32>
      %43 = arith.mulf %42, %41 : vector<8x32xf32>
      %44 = math.tanh %43 : vector<8x32xf32>
      %cst_32 = arith.constant 5.000000e-01 : f32
      %45 = vector.broadcast %cst_32 : f32 to vector<8x32xf32>
      %46 = arith.mulf %45, %44 : vector<8x32xf32>
      %cst_33 = arith.constant 5.000000e-01 : f32
      %47 = vector.broadcast %cst_33 : f32 to vector<8x32xf32>
      %48 = arith.addf %46, %47 : vector<8x32xf32>
      %49 = vector.extract_strided_slice %32 {offsets = [0, 64], sizes = [8, 32], strides = [1, 1]} : vector<8x128xf32> to vector<8x32xf32>
      %50 = math.tanh %49 : vector<8x32xf32>
      %51 = vector.extract_strided_slice %32 {offsets = [0, 96], sizes = [8, 32], strides = [1, 1]} : vector<8x128xf32> to vector<8x32xf32>
      %cst_34 = arith.constant 5.000000e-01 : f32
      %52 = vector.broadcast %cst_34 : f32 to vector<8x32xf32>
      %53 = arith.mulf %52, %51 : vector<8x32xf32>
      %54 = math.tanh %53 : vector<8x32xf32>
      %cst_35 = arith.constant 5.000000e-01 : f32
      %55 = vector.broadcast %cst_35 : f32 to vector<8x32xf32>
      %56 = arith.mulf %55, %54 : vector<8x32xf32>
      %cst_36 = arith.constant 5.000000e-01 : f32
      %57 = vector.broadcast %cst_36 : f32 to vector<8x32xf32>
      %58 = arith.addf %56, %57 : vector<8x32xf32>
      %59 = arith.mulf %48, %arg14 : vector<8x32xf32>
      %60 = arith.mulf %40, %50 : vector<8x32xf32>
      %61 = arith.addf %59, %60 : vector<8x32xf32>
      %62 = math.tanh %61 : vector<8x32xf32>
      %63 = arith.mulf %58, %62 : vector<8x32xf32>
      %64 = arith.index_cast %27 : i32 to index
      %c0_37 = arith.constant 0 : index
      %65 = vector.load %arg7[%64, %c0_37] : memref<64x32xf32, #tpu.memory_space<vmem>>, vector<8x32xf32>
      tpu.vector_store %arg7[%64, %c0_37], %63 {strides = array<i32>} : memref<64x32xf32, #tpu.memory_space<vmem>>, vector<8x32xf32>,
      scf.yield %63, %61 : vector<8x32xf32>, vector<8x32xf32>
    }
    %c0_17 = arith.constant 0 : index
    %c0_18 = arith.constant 0 : index
    %21 = vector.load %arg9[%c0_17, %c0_18] : memref<8x32xf32, #tpu.memory_space<vmem>>, vector<8x32xf32>
    tpu.vector_store %arg9[%c0_17, %c0_18], %20#0 {strides = array<i32>} : memref<8x32xf32, #tpu.memory_space<vmem>>, vector<8x32xf32>,
    %c0_19 = arith.constant 0 : index
    %c0_20 = arith.constant 0 : index
    %22 = vector.load %arg10[%c0_19, %c0_20] : memref<8x32xf32, #tpu.memory_space<vmem>>, vector<8x32xf32>
    tpu.vector_store %arg10[%c0_19, %c0_20], %20#1 {strides = array<i32>} : memref<8x32xf32, #tpu.memory_space<vmem>>, vector<8x32xf32>,
    %c0_i32_21 = arith.constant 0 : i32
    %23 = arith.cmpi eq, %arg0, %c0_i32_21 : i32
    %24 = arith.extui %23 : i1 to i32
    %c0_i32_22 = arith.constant 0 : i32
    %25 = arith.cmpi ne, %24, %c0_i32_22 : i32
    scf.if %25 {
      %c0_23 = arith.constant 0 : index
      %c0_24 = arith.constant 0 : index
      %26 = vector.load %arg8[%c0_23, %c0_24] : memref<8x32xf32, #tpu.memory_space<vmem>>, vector<8x32xf32>
      tpu.vector_store %arg8[%c0_23, %c0_24], %20#1 {strides = array<i32>} : memref<8x32xf32, #tpu.memory_space<vmem>>, vector<8x32xf32>,
    } else {
    }
    return
  }
  func.func @transform_0(%arg0: i32) -> (i32, i32) {
    %c0_i32 = arith.constant 0 : i32
    %c0_i32_0 = arith.constant 0 : i32
    return %arg0, %c0_i32 : i32, i32
  }
  func.func @transform_1(%arg0: i32) -> (i32, i32) {
    %c0_i32 = arith.constant 0 : i32
    %c0_i32_0 = arith.constant 0 : i32
    %c0_i32_1 = arith.constant 0 : i32
    return %c0_i32, %c0_i32_0 : i32, i32
  }
  func.func @transform_2(%arg0: i32) -> (i32, i32) {
    %c0_i32 = arith.constant 0 : i32
    %c0_i32_0 = arith.constant 0 : i32
    %c0_i32_1 = arith.constant 0 : i32
    return %c0_i32, %c0_i32_0 : i32, i32
  }
  func.func @transform_3(%arg0: i32) -> (i32, i32) {
    %c0_i32 = arith.constant 0 : i32
    %c0_i32_0 = arith.constant 0 : i32
    %c0_i32_1 = arith.constant 0 : i32
    return %c0_i32, %c0_i32_0 : i32, i32
  }
  func.func @transform_4(%arg0: i32) -> (i32, i32) {
    %c0_i32 = arith.constant 0 : i32
    %c0_i32_0 = arith.constant 0 : i32
    %c0_i32_1 = arith.constant 0 : i32
    return %c0_i32, %c0_i32_0 : i32, i32
  }
  func.func @transform_5(%arg0: i32) -> (i32, i32) {
    %c0_i32 = arith.constant 0 : i32
    %c0_i32_0 = arith.constant 0 : i32
    %c0_i32_1 = arith.constant 0 : i32
    return %c0_i32, %c0_i32_0 : i32, i32
  }
  func.func @transform_6(%arg0: i32) -> (i32, i32) {
    %c0_i32 = arith.constant 0 : i32
    %c0_i32_0 = arith.constant 0 : i32
    return %arg0, %c0_i32 : i32, i32
  }
  func.func @transform_7(%arg0: i32) -> (i32, i32) {
    %c0_i32 = arith.constant 0 : i32
    %c0_i32_0 = arith.constant 0 : i32
    %c0_i32_1 = arith.constant 0 : i32
    return %c0_i32, %c0_i32_0 : i32, i32
  }
}

module attributes {stable_mosaic.version = 11 : i64} {
  func.func @_lstm_layer_kernel(%arg0: i32, %arg1: memref<64x32xf32, #tpu.memory_space<vmem>>, %arg2: memref<32x128xf32, #tpu.memory_space<vmem>>, %arg3: memref<32x128xf32, #tpu.memory_space<vmem>>, %arg4: memref<1x128xf32, #tpu.memory_space<vmem>>, %arg5: memref<8x32xf32, #tpu.memory_space<vmem>>, %arg6: memref<8x32xf32, #tpu.memory_space<vmem>>, %arg7: memref<64x32xf32, #tpu.memory_space<vmem>>, %arg8: memref<8x32xf32, #tpu.memory_space<vmem>>, %arg9: memref<8x32xf32, #tpu.memory_space<vmem>>, %arg10: memref<8x32xf32, #tpu.memory_space<vmem>>, %arg11: memref<64x128xf32, #tpu.memory_space<vmem>>) attributes {dimension_semantics = [#tpu.dimension_semantics<arbitrary>], iteration_bounds = array<i64: 1>, scalar_prefetch = 0 : i64, scratch_operands = 3 : i64, tpu.core_type = #tpu.core_type<tc>, window_params = [{transform_indices = @transform_0, window_bounds = array<i64: 64, 32>}, {pipeline_mode = #tpu.pipeline_mode<synchronous>, transform_indices = @transform_1, window_bounds = array<i64: 32, 128>}, {pipeline_mode = #tpu.pipeline_mode<synchronous>, transform_indices = @transform_2, window_bounds = array<i64: 32, 128>}, {pipeline_mode = #tpu.pipeline_mode<synchronous>, transform_indices = @transform_3, window_bounds = array<i64: 1, 128>}, {pipeline_mode = #tpu.pipeline_mode<synchronous>, transform_indices = @transform_4, window_bounds = array<i64: 8, 32>}, {pipeline_mode = #tpu.pipeline_mode<synchronous>, transform_indices = @transform_5, window_bounds = array<i64: 8, 32>}, {transform_indices = @transform_6, window_bounds = array<i64: 64, 32>}, {pipeline_mode = #tpu.pipeline_mode<synchronous>, transform_indices = @transform_7, window_bounds = array<i64: 8, 32>}]} {
    %c0_i32 = arith.constant 0 : i32
    %0 = arith.cmpi eq, %arg0, %c0_i32 : i32
    %1 = arith.extui %0 : i1 to i32
    %c0_i32_0 = arith.constant 0 : i32
    %2 = arith.cmpi ne, %1, %c0_i32_0 : i32
    scf.if %2 {
      %c0_23 = arith.constant 0 : index
      %c0_24 = arith.constant 0 : index
      %26 = vector.load %arg5[%c0_23, %c0_24] : memref<8x32xf32, #tpu.memory_space<vmem>>, vector<8x32xf32>
      %c0_25 = arith.constant 0 : index
      %c0_26 = arith.constant 0 : index
      %27 = vector.load %arg9[%c0_25, %c0_26] : memref<8x32xf32, #tpu.memory_space<vmem>>, vector<8x32xf32>
      tpu.vector_store %arg9[%c0_25, %c0_26], %26 {strides = array<i32>} : memref<8x32xf32, #tpu.memory_space<vmem>>, vector<8x32xf32>,
      %c0_27 = arith.constant 0 : index
      %c0_28 = arith.constant 0 : index
      %28 = vector.load %arg6[%c0_27, %c0_28] : memref<8x32xf32, #tpu.memory_space<vmem>>, vector<8x32xf32>
      %c0_29 = arith.constant 0 : index
      %c0_30 = arith.constant 0 : index
      %29 = vector.load %arg10[%c0_29, %c0_30] : memref<8x32xf32, #tpu.memory_space<vmem>>, vector<8x32xf32>
      tpu.vector_store %arg10[%c0_29, %c0_30], %28 {strides = array<i32>} : memref<8x32xf32, #tpu.memory_space<vmem>>, vector<8x32xf32>,
    } else {
    }
    %c8_i32 = arith.constant 8 : i32
    %3 = arith.muli %arg0, %c8_i32 : i32
    %c8_i32_1 = arith.constant 8 : i32
    %4 = arith.subi %c8_i32_1, %3 : i32
    %c8_i32_2 = arith.constant 8 : i32
    %5 = arith.minsi %c8_i32_2, %4 : i32
    %c8_i32_3 = arith.constant 8 : i32
    %6 = arith.cmpi slt, %5, %c8_i32_3 : i32
    %7 = arith.extui %6 : i1 to i32
    %c0_i32_4 = arith.constant 0 : i32
    %8 = arith.cmpi ne, %7, %c0_i32_4 : i32
    scf.if %8 {
      %cst_23 = arith.constant 0.000000e+00 : f32
      %26 = vector.broadcast %cst_23 : f32 to vector<64x32xf32>
      %c0_24 = arith.constant 0 : index
      %c0_25 = arith.constant 0 : index
      %27 = vector.load %arg7[%c0_24, %c0_25] : memref<64x32xf32, #tpu.memory_space<vmem>>, vector<64x32xf32>
      tpu.vector_store %arg7[%c0_24, %c0_25], %26 {strides = array<i32>} : memref<64x32xf32, #tpu.memory_space<vmem>>, vector<64x32xf32>,
    } else {
    }
    %c0 = arith.constant 0 : index
    %c0_5 = arith.constant 0 : index
    %9 = vector.load %arg1[%c0, %c0_5] : memref<64x32xf32, #tpu.memory_space<vmem>>, vector<64x32xf32>
    %c0_6 = arith.constant 0 : index
    %c0_7 = arith.constant 0 : index
    %10 = vector.load %arg2[%c0_6, %c0_7] : memref<32x128xf32, #tpu.memory_space<vmem>>, vector<32x128xf32>
    %cst = arith.constant dense<0.000000e+00> : vector<64x128xf32>
    %11 = tpu.matmul %9, %10, %cst {dimension_numbers = #tpu.dot_dimension_numbers<[1], [0], [0], [1], [0, 0, 1, 1], [], []>} : vector<64x32xf32>, vector<32x128xf32>, vector<64x128xf32> -> vector<64x128xf32>
    %c0_8 = arith.constant 0 : index
    %c0_9 = arith.constant 0 : index
    %12 = vector.load %arg4[%c0_8, %c0_9] : memref<1x128xf32, #tpu.memory_space<vmem>>, vector<1x128xf32>
    %13 = vector.broadcast %12 : vector<1x128xf32> to vector<64x128xf32>
    %14 = arith.addf %11, %13 : vector<64x128xf32>
    %c0_10 = arith.constant 0 : index
    %c0_11 = arith.constant 0 : index
    %15 = vector.load %arg11[%c0_10, %c0_11] : memref<64x128xf32, #tpu.memory_space<vmem>>, vector<64x128xf32>
    tpu.vector_store %arg11[%c0_10, %c0_11], %14 {strides = array<i32>} : memref<64x128xf32, #tpu.memory_space<vmem>>, vector<64x128xf32>,
    %c0_12 = arith.constant 0 : index
    %c0_13 = arith.constant 0 : index
    %16 = vector.load %arg9[%c0_12, %c0_13] : memref<8x32xf32, #tpu.memory_space<vmem>>, vector<8x32xf32>
    %c0_14 = arith.constant 0 : index
    %c0_15 = arith.constant 0 : index
    %17 = vector.load %arg10[%c0_14, %c0_15] : memref<8x32xf32, #tpu.memory_space<vmem>>, vector<8x32xf32>
    %c0_i32_16 = arith.constant 0 : i32
    %18 = arith.subi %5, %c0_i32_16 : i32
    %19 = arith.addi %c0_i32_16, %18 : i32
    %c1_i32 = arith.constant 1 : i32
    %20:2 = scf.for %arg12 = %c0_i32_16 to %19 step %c1_i32 iter_args(%arg13 = %16, %arg14 = %17) -> (vector<8x32xf32>, vector<8x32xf32>)  : i32 {
      %c8_i32_23 = arith.constant 8 : i32
      %26 = arith.muli %arg12, %c8_i32_23 : i32
      %27 = tpu.assume_multiple %26, 8 : i32
      %28 = arith.index_cast %27 : i32 to index
      %c0_24 = arith.constant 0 : index
      %29 = vector.load %arg11[%28, %c0_24] : memref<64x128xf32, #tpu.memory_space<vmem>>, vector<8x128xf32>
      %c0_25 = arith.constant 0 : index
      %c0_26 = arith.constant 0 : index
      %30 = vector.load %arg3[%c0_25, %c0_26] : memref<32x128xf32, #tpu.memory_space<vmem>>, vector<32x128xf32>
      %cst_27 = arith.constant dense<0.000000e+00> : vector<8x128xf32>
      %31 = tpu.matmul %arg13, %30, %cst_27 {dimension_numbers = #tpu.dot_dimension_numbers<[1], [0], [0], [1], [0, 0, 1, 1], [], []>} : vector<8x32xf32>, vector<32x128xf32>, vector<8x128xf32> -> vector<8x128xf32>
      %32 = arith.addf %29, %31 : vector<8x128xf32>
      %33 = vector.extract_strided_slice %32 {offsets = [0, 0], sizes = [8, 32], strides = [1, 1]} : vector<8x128xf32> to vector<8x32xf32>
      %cst_28 = arith.constant 5.000000e-01 : f32
      %34 = vector.broadcast %cst_28 : f32 to vector<8x32xf32>
      %35 = arith.mulf %34, %33 : vector<8x32xf32>
      %36 = math.tanh %35 : vector<8x32xf32>
      %cst_29 = arith.constant 5.000000e-01 : f32
      %37 = vector.broadcast %cst_29 : f32 to vector<8x32xf32>
      %38 = arith.mulf %37, %36 : vector<8x32xf32>
      %cst_30 = arith.constant 5.000000e-01 : f32
      %39 = vector.broadcast %cst_30 : f32 to vector<8x32xf32>
      %40 = arith.addf %38, %39 : vector<8x32xf32>
      %41 = vector.extract_strided_slice %32 {offsets = [0, 32], sizes = [8, 32], strides = [1, 1]} : vector<8x128xf32> to vector<8x32xf32>
      %cst_31 = arith.constant 5.000000e-01 : f32
      %42 = vector.broadcast %cst_31 : f32 to vector<8x32xf32>
      %43 = arith.mulf %42, %41 : vector<8x32xf32>
      %44 = math.tanh %43 : vector<8x32xf32>
      %cst_32 = arith.constant 5.000000e-01 : f32
      %45 = vector.broadcast %cst_32 : f32 to vector<8x32xf32>
      %46 = arith.mulf %45, %44 : vector<8x32xf32>
      %cst_33 = arith.constant 5.000000e-01 : f32
      %47 = vector.broadcast %cst_33 : f32 to vector<8x32xf32>
      %48 = arith.addf %46, %47 : vector<8x32xf32>
      %49 = vector.extract_strided_slice %32 {offsets = [0, 64], sizes = [8, 32], strides = [1, 1]} : vector<8x128xf32> to vector<8x32xf32>
      %50 = math.tanh %49 : vector<8x32xf32>
      %51 = vector.extract_strided_slice %32 {offsets = [0, 96], sizes = [8, 32], strides = [1, 1]} : vector<8x128xf32> to vector<8x32xf32>
      %cst_34 = arith.constant 5.000000e-01 : f32
      %52 = vector.broadcast %cst_34 : f32 to vector<8x32xf32>
      %53 = arith.mulf %52, %51 : vector<8x32xf32>
      %54 = math.tanh %53 : vector<8x32xf32>
      %cst_35 = arith.constant 5.000000e-01 : f32
      %55 = vector.broadcast %cst_35 : f32 to vector<8x32xf32>
      %56 = arith.mulf %55, %54 : vector<8x32xf32>
      %cst_36 = arith.constant 5.000000e-01 : f32
      %57 = vector.broadcast %cst_36 : f32 to vector<8x32xf32>
      %58 = arith.addf %56, %57 : vector<8x32xf32>
      %59 = arith.mulf %48, %arg14 : vector<8x32xf32>
      %60 = arith.mulf %40, %50 : vector<8x32xf32>
      %61 = arith.addf %59, %60 : vector<8x32xf32>
      %62 = math.tanh %61 : vector<8x32xf32>
      %63 = arith.mulf %58, %62 : vector<8x32xf32>
      %64 = arith.index_cast %27 : i32 to index
      %c0_37 = arith.constant 0 : index
      %65 = vector.load %arg7[%64, %c0_37] : memref<64x32xf32, #tpu.memory_space<vmem>>, vector<8x32xf32>
      tpu.vector_store %arg7[%64, %c0_37], %63 {strides = array<i32>} : memref<64x32xf32, #tpu.memory_space<vmem>>, vector<8x32xf32>,
      scf.yield %63, %61 : vector<8x32xf32>, vector<8x32xf32>
    }
    %c0_17 = arith.constant 0 : index
    %c0_18 = arith.constant 0 : index
    %21 = vector.load %arg9[%c0_17, %c0_18] : memref<8x32xf32, #tpu.memory_space<vmem>>, vector<8x32xf32>
    tpu.vector_store %arg9[%c0_17, %c0_18], %20#0 {strides = array<i32>} : memref<8x32xf32, #tpu.memory_space<vmem>>, vector<8x32xf32>,
    %c0_19 = arith.constant 0 : index
    %c0_20 = arith.constant 0 : index
    %22 = vector.load %arg10[%c0_19, %c0_20] : memref<8x32xf32, #tpu.memory_space<vmem>>, vector<8x32xf32>
    tpu.vector_store %arg10[%c0_19, %c0_20], %20#1 {strides = array<i32>} : memref<8x32xf32, #tpu.memory_space<vmem>>, vector<8x32xf32>,
    %c0_i32_21 = arith.constant 0 : i32
    %23 = arith.cmpi eq, %arg0, %c0_i32_21 : i32
    %24 = arith.extui %23 : i1 to i32
    %c0_i32_22 = arith.constant 0 : i32
    %25 = arith.cmpi ne, %24, %c0_i32_22 : i32
    scf.if %25 {
      %c0_23 = arith.constant 0 : index
      %c0_24 = arith.constant 0 : index
      %26 = vector.load %arg8[%c0_23, %c0_24] : memref<8x32xf32, #tpu.memory_space<vmem>>, vector<8x32xf32>
      tpu.vector_store %arg8[%c0_23, %c0_24], %20#1 {strides = array<i32>} : memref<8x32xf32, #tpu.memory_space<vmem>>, vector<8x32xf32>,
    } else {
    }
    return
  }
  func.func @transform_0(%arg0: i32) -> (i32, i32) {
    %c0_i32 = arith.constant 0 : i32
    %c0_i32_0 = arith.constant 0 : i32
    return %arg0, %c0_i32 : i32, i32
  }
  func.func @transform_1(%arg0: i32) -> (i32, i32) {
    %c0_i32 = arith.constant 0 : i32
    %c0_i32_0 = arith.constant 0 : i32
    %c0_i32_1 = arith.constant 0 : i32
    return %c0_i32, %c0_i32_0 : i32, i32
  }
  func.func @transform_2(%arg0: i32) -> (i32, i32) {
    %c0_i32 = arith.constant 0 : i32
    %c0_i32_0 = arith.constant 0 : i32
    %c0_i32_1 = arith.constant 0 : i32
    return %c0_i32, %c0_i32_0 : i32, i32
  }
  func.func @transform_3(%arg0: i32) -> (i32, i32) {
    %c0_i32 = arith.constant 0 : i32
    %c0_i32_0 = arith.constant 0 : i32
    %c0_i32_1 = arith.constant 0 : i32
    return %c0_i32, %c0_i32_0 : i32, i32
  }
  func.func @transform_4(%arg0: i32) -> (i32, i32) {
    %c0_i32 = arith.constant 0 : i32
    %c0_i32_0 = arith.constant 0 : i32
    %c0_i32_1 = arith.constant 0 : i32
    return %c0_i32, %c0_i32_0 : i32, i32
  }
  func.func @transform_5(%arg0: i32) -> (i32, i32) {
    %c0_i32 = arith.constant 0 : i32
    %c0_i32_0 = arith.constant 0 : i32
    %c0_i32_1 = arith.constant 0 : i32
    return %c0_i32, %c0_i32_0 : i32, i32
  }
  func.func @transform_6(%arg0: i32) -> (i32, i32) {
    %c0_i32 = arith.constant 0 : i32
    %c0_i32_0 = arith.constant 0 : i32
    return %arg0, %c0_i32 : i32, i32
  }
  func.func @transform_7(%arg0: i32) -> (i32, i32) {
    %c0_i32 = arith.constant 0 : i32
    %c0_i32_0 = arith.constant 0 : i32
    %c0_i32_1 = arith.constant 0 : i32
    return %c0_i32, %c0_i32_0 : i32, i32
  }
}

</mosaic_0001>

<bundles_post_ra>
// kernel: inference_lstm_forward.2
= control target key start
LH: loop header
LB: loop body
LE: loop exit
PB: predicated region body
PF: predicated region fallthrough
CT: control target
= control target key end

     0   :  { %vm30_vm0 = vcmask 261120   ;;  %vm68_vm1 = vcmask 130048   ;;  %s630_s1 = inlined_call_operand.vmem [shape: f32[16,128], index: 1, kind: input, shape index: {}]   ;;  %s631_s2 = inlined_call_operand.vmem [shape: f32[32,128], index: 2, kind: input, shape index: {}]   ;;  %s632_s4 = inlined_call_operand.vmem [shape: f32[8,32], index: 4, kind: input, shape index: {}]   ;;  %s633_s5 = inlined_call_operand.vmem [shape: f32[8,32], index: 5, kind: input, shape index: {}]   ;;  %s634_s6 = inlined_call_operand.vmem [shape: f32[64,32], index: 6, kind: output, shape index: {0}]   ;;  %s635_s7 = inlined_call_operand.vmem [shape: f32[8,32], index: 7, kind: output, shape index: {1}]   ;;  %s636_s0 = inlined_call_operand.vmem [shape: f32[64,16], index: 0, kind: input, shape index: {}]   ;;  %s637_s3 = inlined_call_operand.vmem [shape: f32[1,128], index: 3, kind: input, shape index: {}]  }
   0x1   :  { %v29_v0 = vld [vmem:[%s632_s4] sm:$0xff]  ;;  %v60_v3 = vld [vmem:[%s630_s1 + $0x8] sm:$0xff]  ;;  %v53_v9 = vld [vmem:[%s636_s0 + $0x10] sm:$0xff] }
   0x2   :  { %v32_v1 = vld [vmem:[%s633_s5] sm:$0xff]  ;;  %31 = vst.msk [vmem:[#allocation2] sm:$0xff] %vm30_vm0, %v29_v0  ;;  %v52_v7 = vld [vmem:[%s636_s0 + $0x8] sm:$0xff]  ;;  %v57_v10 = vld [vmem:[%s636_s0 + $0x30] sm:$0xff] }
   0x3   :  { %v59_v2 = vld [vmem:[%s630_s1] sm:$0xff]  ;;  %33 = vst.msk [vmem:[#allocation3] sm:$0xff] %vm30_vm0, %v32_v1  ;;  %v56_v8 = vld [vmem:[%s636_s0 + $0x28] sm:$0xff]  ;;  %v54_v11 = vld [vmem:[%s636_s0 + $0x18] sm:$0xff] }
   0x4   :  { %v51_v4 = vld [vmem:[%s636_s0] sm:$0xff]  ;;  %v417_v6 = vpack.c.bf16 %v60_v3, %v59_v2  ;;  %v58_v12 = vld [vmem:[%s636_s0 + $0x38] sm:$0xff] }
   0x5   :  { %v55_v5 = vld [vmem:[%s636_s0 + $0x20] sm:$0xff]  ;;  %394 = vmatprep.mubr.msk.f32.mxu0 %vm68_vm1, %v51_v4  ;;  %s588_s0 = smov 0  }
   0x6   :  { %400 = vmatprep.mubr.msk.f32.mxu1 %vm68_vm1, %v55_v5  ;;  %418 = vmatprep.subr.bf16.mxu0 %v417_v6  ;;  %v364_v15 = vld [vmem:[%s637_s3] ss:$0 sm:$0xff] }
   0x7   :  { %427 = vmatprep.subr.bf16.mxu1 %v417_v6  ;;  %420 = vmatpush3.bf16.msra.mxu0 %v417_v6 }
   0x8   :  { %428 = vmatpush3.bf16.msra.mxu1 %v417_v6 }
   0x9   :  { %v206_v13 = vld [vmem:[#allocation2] sm:$0xff]  }
   0xa   :  { %395 = vmatmul.mubr.msk.f32.vlgmr.msra.gmra.mrb[0].mxu0 %vm68_vm1, %v52_v7  ;;  %v207_v14 = vld [vmem:[#allocation3] sm:$0xff]  }
   0xb   :  { %401 = vmatmul.mubr.msk.f32.vlgmr.msra.gmra.mrb[0].mxu1 %vm68_vm1, %v56_v8  ;;  %397 = vmatprep.mubr.msk.f32.mxu0 %vm68_vm1, %v53_v9 }
   0xc   :  { %403 = vmatprep.mubr.msk.f32.mxu1 %vm68_vm1, %v57_v10 }
   0xe   :  { %398 = vmatmul.mubr.msk.f32.gmra.mrb[2].mxu0 %vm68_vm1, %v54_v11 }
   0xf   :  { %404 = vmatmul.mubr.msk.f32.gmra.mrb[2].mxu1 %vm68_vm1, %v58_v12 }
  0xdd   :  { %v396_v16 = vpop.f32.mrb[0].mxu0 }
  0xde   :  { %v402_v17 = vpop.f32.mrb[0].mxu1  ;;  %v165_v18 = vadd.f32 %v396_v16, %v364_v15  ;;  %v159_v20 = vpop.f32.mrb[1].mxu0 }
  0xdf   :  { %v185_v19 = vadd.f32 %v402_v17, %v364_v15  ;;  %v179_v21 = vpop.f32.mrb[1].mxu1  ;;  %v160_v22 = vadd.f32 %v364_v15, %v159_v20 }
  0xe0   :  { %v180_v23 = vadd.f32 %v364_v15, %v179_v21  ;;  %199 = vst [vmem:[#allocation4 + $0x8] sm:$0xff] %v165_v18 }
  0xe1   :  { %203 = vst [vmem:[#allocation4 + $0x28] sm:$0xff] %v185_v19  ;;  %198 = vst [vmem:[#allocation4] sm:$0xff] %v160_v22  ;;  %v399_v24 = vpop.f32.mrb[2].mxu0 }
  0xe2   :  { %202 = vst [vmem:[#allocation4 + $0x20] sm:$0xff] %v180_v23  ;;  %v405_v25 = vpop.f32.mrb[2].mxu1  ;;  %v175_v26 = vadd.f32 %v399_v24, %v364_v15  ;;  %v169_v28 = vpop.f32.mrb[3].mxu0 }
  0xe3   :  { %v195_v27 = vadd.f32 %v405_v25, %v364_v15  ;;  %v189_v29 = vpop.f32.mrb[3].mxu1  ;;  %v170_v30 = vadd.f32 %v364_v15, %v169_v28 }
  0xe4   :  { %v190_v31 = vadd.f32 %v364_v15, %v189_v29  ;;  %201 = vst [vmem:[#allocation4 + $0x18] sm:$0xff] %v175_v26 }
  0xe5   :  { %205 = vst [vmem:[#allocation4 + $0x38] sm:$0xff] %v195_v27  ;;  %200 = vst [vmem:[#allocation4 + $0x10] sm:$0xff] %v170_v30 }
  0xe6   :  { %204 = vst [vmem:[#allocation4 + $0x30] sm:$0xff] %v190_v31 }
  0xe7 LB: > { %v219_v32 = vld [vmem:[%s631_s2] sm:$0xff]  ;;  %v220_v33 = vld [vmem:[%s631_s2 + $0x8] sm:$0xff]  ;;  %v221_v34 = vld [vmem:[%s631_s2 + $0x10] sm:$0xff]  ;;  %v489_v35 = vmov 0.0|0.0   ;;  %vm490_vm2 = vmmov 0   ;;  %v491_v38 = vmov 0.0   ;;  %s487_s0 = sphi %s588_s0, %s211_s0   ;;  %v483_v13 = vphi %v206_v13, %v639_v13   ;;  %v479_v14 = vphi %v207_v14, %v638_v14  }
  0xe8   : > { %421 = vmatprep.subr.bf16.mxu0 %v489_v35  ;;  %v422_v36 = vpack.c.bf16 %v220_v33, %v219_v32  ;;  %v222_v37 = vld [vmem:[%s631_s2 + $0x18] sm:$0xff]  ;;  %414 = vmatprep.mubr.msk.f32.mxu0 %vm490_vm2, %v491_v38  ;;  %s373_s8 = sshll.u32 %s487_s0, 3  ;;  %s492_s10 = smov 64  }
  0xe9   : > { %v425_v39 = vpack.c.bf16 %v222_v37, %v221_v34  ;;  %s217_s9 = scalar_lea.vmem [#allocation4], %s373_s8  ;;  %s493_s4 = smov 32  }
  0xea   : > { %423 = vmatpush3.bf16.msra.mxu0 %v422_v36  ;;  %s494_s11 = smov 96   ;;  %s328_s1 = scalar_lea.vmem %s634_s6, %s373_s8 }
  0xeb   : > { %424 = vmatprep.subr.bf16.mxu0 %v489_v35  ;;  %s211_s0 = sadd.s32 1, %s487_s0  }
  0xec   : > { %p210_p0 = scmp.ge.s32.totalorder %s211_s0, 8 }
  0xed   : > { %v218_v40 = vld [vmem:[%s217_s9] sm:$0xff] }
  0xee   : > { %426 = vmatpush3.bf16.msra.mxu0 %v425_v39 }
  0xf1   : > { %415 = vmatmul.mubr.msk.f32.vlgmr.msra.gmra.mrb[0].mxu0 %vm30_vm0, %v483_v13 }
 0x1c4   : > { %v293_v41 = vpop.f32.mrb[0].mxu0 }
 0x1c5   : > { %v297_v42 = vadd.f32 %v293_v41, %v218_v40  ;;  %v416_v43 = vpop.f32.mrb[1].mxu0 }
 0x1c7   : > { %459 = vtanh.f32 %v297_v42  ;;  %v298_v45 = vmul.f32 0.5, %v297_v42 }
 0x1c9   : > { %461 = vtanh.f32 %v298_v45 }
 0x1d1   : > { %v460_v44 = vpop.eup %459 }
 0x1d2   : > { %309 = vrot.lane.b32.xlu0 %v460_v44, %s492_s10 }
 0x1d3   : > { %v462_v46 = vpop.eup %461 }
 0x1d4   : > { %v300_v47 = vmul.f32 0.5, %v462_v46 }
 0x1d6   : > { %304 = vrot.lane.b32.xlu0 %v479_v14, %s493_s4  ;;  %v301_v48 = vadd.f32 0.5, %v300_v47 }
 0x244   : > { %v310_v49 = vpop.permute.xlu0 %309 }
 0x245   : > { %v312_v50 = vmul.f32 %v310_v49, %v301_v48 }
 0x247   : > { %314 = vrot.lane.b32.xlu1 %v312_v50, %s493_s4 }
 0x248   : > { %v305_v51 = vpop.permute.xlu0 %304 }
 0x249   : > { %v307_v52 = vmul.f32 %v305_v51, %v301_v48 }
 0x2b9   : > { %v315_v53 = vpop.permute.xlu1 %314 }
 0x2ba   : > { %v317_v54 = vadd.f32 %v315_v53, %v307_v52 }
 0x2bc   : > { %463 = vtanh.f32 %v317_v54 }
 0x2c6   : > { %v464_v55 = vpop.eup %463 }
 0x2c7   : > { %320 = vrot.lane.b32.xlu1 %v464_v55, %s492_s10 }
 0x2cb   : > { %331 = vrot.lane.b32.xlu1 %v317_v54, %s494_s11 }
 0x339   : > { %v321_v56 = vpop.permute.xlu1 %320 }
 0x33a   : > { %v323_v57 = vmul.f32 %v321_v56, %v301_v48 }
 0x33c   : > { %325 = vrot.lane.b32.xlu0 %v323_v57, %s493_s4 }
 0x33d   : > { %v332_v58 = vpop.permute.xlu1 %331  }
 0x33e   : > { %v638_v14 = vmov %v332_v58  ;;  %336 = vst.msk [vmem:[#allocation3] sm:$0xff] (%p210_p0), %vm30_vm0, %v332_v58  ;;  %340 = vst.msk [vmem:[%s635_s7] sm:$0xff] (%p210_p0), %vm30_vm0, %v332_v58 }
 0x3a9   :  { %213 = sbr.rel (!%p210_p0) target bundleno = 231 (0xe7), region = 73 }
 0x3ae   : > { %v326_v59 = vpop.permute.xlu0 %325  }
 0x3af   : > { %329 = vst.msk [vmem:[%s328_s1] sm:$0xff] %vm30_vm0, %v326_v59  ;;  %v639_v13 = vmov %v326_v59  ;;  %335 = vst.msk [vmem:[#allocation2] sm:$0xff] (%p210_p0), %vm30_vm0, %v326_v59 }

// kernel: inference_lstm_forward.3
= control target key start
LH: loop header
LB: loop body
LE: loop exit
PB: predicated region body
PF: predicated region fallthrough
CT: control target
= control target key end

     0   :  { %vm30_vm0 = vcmask 261120   ;;  %s648_s1 = inlined_call_operand.vmem [shape: f32[32,128], index: 1, kind: input, shape index: {}]   ;;  %s649_s2 = inlined_call_operand.vmem [shape: f32[32,128], index: 2, kind: input, shape index: {}]   ;;  %s650_s6 = inlined_call_operand.vmem [shape: f32[64,32], index: 6, kind: output, shape index: {0}]   ;;  %s651_s7 = inlined_call_operand.vmem [shape: f32[8,32], index: 7, kind: output, shape index: {1}]   ;;  %s652_s4 = inlined_call_operand.vmem [shape: f32[8,32], index: 4, kind: input, shape index: {}]   ;;  %s653_s5 = inlined_call_operand.vmem [shape: f32[8,32], index: 5, kind: input, shape index: {}]   ;;  %s654_s0 = inlined_call_operand.vmem [shape: f32[64,32], index: 0, kind: input, shape index: {}]   ;;  %s655_s3 = inlined_call_operand.vmem [shape: f32[1,128], index: 3, kind: input, shape index: {}]  }
   0x1   :  { %v59_v0 = vld [vmem:[%s648_s1] sm:$0xff]  ;;  %v60_v1 = vld [vmem:[%s648_s1 + $0x8] sm:$0xff]  ;;  %v61_v2 = vld [vmem:[%s648_s1 + $0x10] sm:$0xff] }
   0x2   :  { %v423_v3 = vpack.c.bf16 %v60_v1, %v59_v0  ;;  %v62_v4 = vld [vmem:[%s648_s1 + $0x18] sm:$0xff]  ;;  %v29_v5 = vld [vmem:[%s652_s4] sm:$0xff]  ;;  %v52_v10 = vld [vmem:[%s654_s0 + $0x8] sm:$0xff] }
   0x3   :  { %v32_v6 = vld [vmem:[%s653_s5] sm:$0xff]  ;;  %v427_v7 = vpack.c.bf16 %v62_v4, %v61_v2  ;;  %31 = vst.msk [vmem:[#allocation2] sm:$0xff] %vm30_vm0, %v29_v5  ;;  %v56_v11 = vld [vmem:[%s654_s0 + $0x28] sm:$0xff]  ;;  %v53_v12 = vld [vmem:[%s654_s0 + $0x10] sm:$0xff] }
   0x4   :  { %33 = vst.msk [vmem:[#allocation3] sm:$0xff] %vm30_vm0, %v32_v6  ;;  %424 = vmatprep.subr.bf16.mxu0 %v423_v3  ;;  %437 = vmatprep.subr.bf16.mxu1 %v423_v3  ;;  %v51_v8 = vld [vmem:[%s654_s0] sm:$0xff]  ;;  %v57_v15 = vld [vmem:[%s654_s0 + $0x30] sm:$0xff]  ;;  %v54_v16 = vld [vmem:[%s654_s0 + $0x18] sm:$0xff] }
   0x5   :  { %v55_v9 = vld [vmem:[%s654_s0 + $0x20] sm:$0xff]  ;;  %426 = vmatpush3.bf16.msra.mxu0 %v423_v3  ;;  %439 = vmatpush3.bf16.msra.mxu1 %v423_v3  ;;  %v58_v17 = vld [vmem:[%s654_s0 + $0x38] sm:$0xff]  ;;  %s606_s0 = smov 0  }
   0x6   :  { %428 = vmatprep.subr.bf16.mxu0 %v427_v7  ;;  %438 = vmatprep.subr.bf16.mxu1 %v427_v7  ;;  %v364_v18 = vld [vmem:[%s655_s3] ss:$0 sm:$0xff] }
   0x7   :  { %400 = vmatprep.mubr.msk.f32.mxu0 %vm30_vm0, %v51_v8  ;;  %406 = vmatprep.mubr.msk.f32.mxu1 %vm30_vm0, %v55_v9 }
   0x9   :  { %430 = vmatpush3.bf16.msra.mxu0 %v427_v7  ;;  %440 = vmatpush3.bf16.msra.mxu1 %v427_v7 }
   0xa   :  { %v208_v13 = vld [vmem:[#allocation2] sm:$0xff]  }
   0xb   :  { %v209_v14 = vld [vmem:[#allocation3] sm:$0xff]  }
   0xc   :  { %401 = vmatmul.mubr.msk.f32.vlgmr.msra.gmra.mrb[0].mxu0 %vm30_vm0, %v52_v10  ;;  %407 = vmatmul.mubr.msk.f32.vlgmr.msra.gmra.mrb[0].mxu1 %vm30_vm0, %v56_v11 }
   0xd   :  { %403 = vmatprep.mubr.msk.f32.mxu0 %vm30_vm0, %v53_v12  ;;  %409 = vmatprep.mubr.msk.f32.mxu1 %vm30_vm0, %v57_v15 }
  0x10   :  { %404 = vmatmul.mubr.msk.f32.gmra.mrb[2].mxu0 %vm30_vm0, %v54_v16  ;;  %410 = vmatmul.mubr.msk.f32.gmra.mrb[2].mxu1 %vm30_vm0, %v58_v17 }
  0xdf   :  { %v402_v19 = vpop.f32.mrb[0].mxu0  ;;  %v408_v20 = vpop.f32.mrb[0].mxu1 }
  0xe0   :  { %v167_v21 = vadd.f32 %v402_v19, %v364_v18  ;;  %v187_v22 = vadd.f32 %v408_v20, %v364_v18  ;;  %v161_v23 = vpop.f32.mrb[1].mxu0  ;;  %v181_v24 = vpop.f32.mrb[1].mxu1 }
  0xe1   :  { %v162_v25 = vadd.f32 %v364_v18, %v161_v23  ;;  %v182_v26 = vadd.f32 %v364_v18, %v181_v24 }
  0xe2   :  { %201 = vst [vmem:[#allocation4 + $0x8] sm:$0xff] %v167_v21  ;;  %205 = vst [vmem:[#allocation4 + $0x28] sm:$0xff] %v187_v22 }
  0xe3   :  { %200 = vst [vmem:[#allocation4] sm:$0xff] %v162_v25  ;;  %204 = vst [vmem:[#allocation4 + $0x20] sm:$0xff] %v182_v26  ;;  %v405_v27 = vpop.f32.mrb[2].mxu0  ;;  %v411_v28 = vpop.f32.mrb[2].mxu1 }
  0xe4   :  { %v177_v29 = vadd.f32 %v405_v27, %v364_v18  ;;  %v197_v30 = vadd.f32 %v411_v28, %v364_v18  ;;  %v171_v31 = vpop.f32.mrb[3].mxu0  ;;  %v191_v32 = vpop.f32.mrb[3].mxu1 }
  0xe5   :  { %v172_v33 = vadd.f32 %v364_v18, %v171_v31  ;;  %v192_v34 = vadd.f32 %v364_v18, %v191_v32 }
  0xe6   :  { %203 = vst [vmem:[#allocation4 + $0x18] sm:$0xff] %v177_v29  ;;  %207 = vst [vmem:[#allocation4 + $0x38] sm:$0xff] %v197_v30 }
  0xe7   :  { %202 = vst [vmem:[#allocation4 + $0x10] sm:$0xff] %v172_v33  ;;  %206 = vst [vmem:[#allocation4 + $0x30] sm:$0xff] %v192_v34 }
  0xe8 LB: > { %v221_v35 = vld [vmem:[%s649_s2] sm:$0xff]  ;;  %v222_v36 = vld [vmem:[%s649_s2 + $0x8] sm:$0xff]  ;;  %v223_v37 = vld [vmem:[%s649_s2 + $0x10] sm:$0xff]  ;;  %v501_v38 = vmov 0.0|0.0   ;;  %vm502_vm1 = vmmov 0   ;;  %v503_v41 = vmov 0.0   ;;  %s499_s0 = sphi %s606_s0, %s213_s0   ;;  %v495_v13 = vphi %v208_v13, %v657_v13   ;;  %v491_v14 = vphi %v209_v14, %v656_v14  }
  0xe9   : > { %431 = vmatprep.subr.bf16.mxu0 %v501_v38  ;;  %v432_v39 = vpack.c.bf16 %v222_v36, %v221_v35  ;;  %v224_v40 = vld [vmem:[%s649_s2 + $0x18] sm:$0xff]  ;;  %420 = vmatprep.mubr.msk.f32.mxu0 %vm502_vm1, %v503_v41  ;;  %s373_s12 = sshll.u32 %s499_s0, 3  ;;  %s504_s14 = smov 64  }
  0xea   : > { %v435_v42 = vpack.c.bf16 %v224_v40, %v223_v37  ;;  %s219_s13 = scalar_lea.vmem [#allocation4], %s373_s12  ;;  %s505_s1 = smov 32  }
  0xeb   : > { %433 = vmatpush3.bf16.msra.mxu0 %v432_v39  ;;  %s506_s15 = smov 96   ;;  %s329_s16 = scalar_lea.vmem %s650_s6, %s373_s12 }
  0xec   : > { %434 = vmatprep.subr.bf16.mxu0 %v501_v38  ;;  %s213_s0 = sadd.s32 1, %s499_s0  }
  0xed   : > { %p212_p0 = scmp.ge.s32.totalorder %s213_s0, 8 }
  0xee   : > { %v220_v43 = vld [vmem:[%s219_s13] sm:$0xff] }
  0xef   : > { %436 = vmatpush3.bf16.msra.mxu0 %v435_v42 }
  0xf2   : > { %421 = vmatmul.mubr.msk.f32.vlgmr.msra.gmra.mrb[0].mxu0 %vm30_vm0, %v495_v13 }
 0x1c5   : > { %v294_v44 = vpop.f32.mrb[0].mxu0 }
 0x1c6   : > { %v298_v45 = vadd.f32 %v294_v44, %v220_v43  ;;  %v422_v46 = vpop.f32.mrb[1].mxu0 }
 0x1c8   : > { %471 = vtanh.f32 %v298_v45  ;;  %v299_v48 = vmul.f32 0.5, %v298_v45 }
 0x1ca   : > { %473 = vtanh.f32 %v299_v48 }
 0x1d2   : > { %v472_v47 = vpop.eup %471 }
 0x1d3   : > { %310 = vrot.lane.b32.xlu0 %v472_v47, %s504_s14 }
 0x1d4   : > { %v474_v49 = vpop.eup %473 }
 0x1d5   : > { %v301_v50 = vmul.f32 0.5, %v474_v49 }
 0x1d7   : > { %305 = vrot.lane.b32.xlu0 %v491_v14, %s505_s1  ;;  %v302_v51 = vadd.f32 0.5, %v301_v50 }
 0x245   : > { %v311_v52 = vpop.permute.xlu0 %310 }
 0x246   : > { %v313_v53 = vmul.f32 %v311_v52, %v302_v51 }
 0x248   : > { %315 = vrot.lane.b32.xlu1 %v313_v53, %s505_s1 }
 0x249   : > { %v306_v54 = vpop.permute.xlu0 %305 }
 0x24a   : > { %v308_v55 = vmul.f32 %v306_v54, %v302_v51 }
 0x2ba   : > { %v316_v56 = vpop.permute.xlu1 %315 }
 0x2bb   : > { %v318_v57 = vadd.f32 %v316_v56, %v308_v55 }
 0x2bd   : > { %475 = vtanh.f32 %v318_v57 }
 0x2c7   : > { %v476_v58 = vpop.eup %475 }
 0x2c8   : > { %321 = vrot.lane.b32.xlu1 %v476_v58, %s504_s14 }
 0x2cc   : > { %332 = vrot.lane.b32.xlu1 %v318_v57, %s506_s15 }
 0x33a   : > { %v322_v59 = vpop.permute.xlu1 %321 }
 0x33b   : > { %v324_v60 = vmul.f32 %v322_v59, %v302_v51 }
 0x33d   : > { %326 = vrot.lane.b32.xlu0 %v324_v60, %s505_s1 }
 0x33e   : > { %v333_v61 = vpop.permute.xlu1 %332  }
 0x33f   : > { %v656_v14 = vmov %v333_v61  ;;  %336 = vst.msk [vmem:[#allocation3] sm:$0xff] (%p212_p0), %vm30_vm0, %v333_v61  ;;  %340 = vst.msk [vmem:[%s651_s7] sm:$0xff] (%p212_p0), %vm30_vm0, %v333_v61 }
 0x3aa   :  { %215 = sbr.rel (!%p212_p0) target bundleno = 232 (0xe8), region = 73 }
 0x3af   : > { %v327_v62 = vpop.permute.xlu0 %326  }
 0x3b0   : > { %330 = vst.msk [vmem:[%s329_s16] sm:$0xff] %vm30_vm0, %v327_v62  ;;  %v657_v13 = vmov %v327_v62  ;;  %335 = vst.msk [vmem:[#allocation2] sm:$0xff] (%p212_p0), %vm30_vm0, %v327_v62 }

</bundles_post_ra>
